<compile_context>
chip_gen: v6e
topology: v6e:2x2x1
jax: 0.10.0
libtpu: 0.0.40
codegen_flags: <defaults>
</compile_context>

<pallas_src>
import functools

import numpy as np
import jax
import jax.numpy as jnp
from jax.experimental import pallas as pl
from jax.experimental.pallas import tpu as pltpu

BN_EPS = 1e-5

_TAP_OFFSETS = tuple((oh, ow) for oh in (-1, 0, 1) for ow in (-1, 0, 1))
_CENTER_TAP = 4  # (0, 0): its mask is all-ones, skip the multiply.


def _pick_images_per_step(N, HW, target_lanes=1024):
    """Images per grid step: wide lane tiles, 128-aligned, >=2 steps if possible."""
    divs = [d for d in range(1, N + 1) if N % d == 0]
    ok = [d for d in divs if (d * HW) % 128 == 0 or d == N]
    cands = [d for d in ok if d * HW <= target_lanes] or [min(ok)]
    nb = max(cands)
    if N // nb < 2:  # keep >= 2 grid steps so v7x's 2 TensorCores both get work
        smaller = [d for d in cands if N // d >= 2]
        if smaller:
            nb = max(smaller)
    return nb


def _tap_masks_and_shifts(H, W, nb, dtype):
    """Static per-tap border masks (9, nb*H*W) and lane-roll shifts.

    Tap t = kh*3 + kw reads x[h+kh-1, w+kw-1]; the mask zeroes out-of-image
    taps AND the lanes where the roll over the nb-image block wraps across an
    image boundary (those are exactly the border lanes).
    """
    HW = H * W
    L = nb * HW
    pos = np.arange(HW)
    h = pos // W
    w = pos % W
    masks = np.ones((9, HW), np.float32)
    shifts = []
    for t, (oh, ow) in enumerate(_TAP_OFFSETS):
        m = np.ones(HW, np.float32)
        if oh == -1:
            m *= (h >= 1)
        elif oh == 1:
            m *= (h <= H - 2)
        if ow == -1:
            m *= (w >= 1)
        elif ow == 1:
            m *= (w <= W - 2)
        masks[t] = m
        d = oh * W + ow
        shifts.append(int((-d) % L))
    masks = np.tile(masks, (1, nb))  # (9, nb*HW), periodic per image
    return jnp.asarray(masks, dtype=dtype), tuple(shifts)


def fused_convblock_kernel(x_ref, m_ref, w1_ref, b1_ref, w2_ref, b2_ref,
                           y_ref, stats_ref, *, shifts, compute_dtype):
    """conv1 -> ReLU -> conv2 -> ReLU, plus packed per-tile BN partial sums.

    x_ref : (Cin, L)        compute_dtype   (L = nb images * H*W lanes)
    m_ref : (9, L)          compute_dtype   precomputed 0/1 border masks
    w*_ref: (9, Cout, Cin)  compute_dtype   per-tap weight matrices (resident)
    b*_ref: (C, 1)          float32
    y_ref : (Cout, L)       float32         lane-dense activation store
    stats_ref: (1, Cout, 2) float32         [sum, sum-of-squares] per channel
    """
    L = x_ref.shape[-1]
    xf = x_ref[...]

    def conv3x3_relu(inp, w_ref, b_ref):
        # 9 accumulated per-tap MXU matmuls: no im2col scratch, no masked
        # sub-sublane stores; taps are XLU lane-rolls + one VPU mask multiply.
        # TODO(synk): at large channel counts, switch to a single K=9*Cin
        # matmul via an 8-sublane-aligned im2col to better feed the MXU.
        cout = w_ref.shape[1]
        acc = jnp.zeros((cout, L), jnp.float32)
        for t, sh in enumerate(shifts):
            tap = inp if sh == 0 else pltpu.roll(inp, shift=sh, axis=1)
            if t != _CENTER_TAP:
                tap = tap * m_ref[t:t + 1, :]
            acc = acc + jnp.dot(w_ref[t], tap,
                                preferred_element_type=jnp.float32)
        return jnp.maximum(acc + b_ref[...], 0.0)          # actfunc = ReLU

    y1 = conv3x3_relu(xf, w1_ref, b1_ref)                  # (Cint, L) f32
    # conv2 straight from registers/VMEM (no HBM round-trip); one cast of y1.
    y2 = conv3x3_relu(y1.astype(compute_dtype), w2_ref, b2_ref)  # (Cout, L)

    y_ref[...] = y2
    s = jnp.sum(y2, axis=1, keepdims=True)
    q = jnp.sum(y2 * y2, axis=1, keepdims=True)
    stats_ref[0] = jnp.concatenate([s, q], axis=1)          # single packed store


def bn_apply_kernel(y_ref, scale_ref, shift_ref, out_ref):
    """Second BN pass: apply globally-reduced per-channel scale/shift (FMA)."""
    out_ref[...] = y_ref[...] * scale_ref[...] + shift_ref[...]


def conv_block_forward(x_nchw, w1_hwio, b1, w2_hwio, b2, gamma, beta,
                       *, compute_dtype=jnp.float32):
    """Pallas implementation of convBlock.forward (actfunc = ReLU).

    x_nchw: (N, Cin, H, W) as in PyTorch; returns (N, Cout, H, W).
    compute_dtype: MXU-input / memory dtype for x, masks, weights and taps
    (jnp.bfloat16 is worthwhile on v5e as well as v6e/v7x — the MXU takes bf16
    at full rate on all three); accumulation, ReLU, bias and all BN math stay
    float32.  In the bf16 path the second conv's input (y1) is also rounded to
    bf16, not just the raw inputs/weights.
    """
    N, Cin, H, W = x_nchw.shape
    HW = H * W
    Cint = w1_hwio.shape[-1]
    Cout = w2_hwio.shape[-1]

    nb = _pick_images_per_step(N, HW)
    n_steps = N // nb
    L = nb * HW

    # One wrapper-side transpose: channels x (batch*spatial), spatial+batch on
    # the 128-lane axis so every matmul / store is lane-dense and wide.
    xf = jnp.transpose(x_nchw, (1, 0, 2, 3)).reshape(Cin, N * HW).astype(compute_dtype)

    # Per-tap weight matrices (9, Cout, Cin), tap-major t = kh*3 + kw.
    w1t = jnp.transpose(w1_hwio, (0, 1, 3, 2)).reshape(9, Cint, Cin).astype(compute_dtype)
    w2t = jnp.transpose(w2_hwio, (0, 1, 3, 2)).reshape(9, Cout, Cint).astype(compute_dtype)
    b1c = b1.reshape(Cint, 1).astype(jnp.float32)
    b2c = b2.reshape(Cout, 1).astype(jnp.float32)

    masks, shifts = _tap_masks_and_shifts(H, W, nb, compute_dtype)

    itm = jnp.dtype(compute_dtype).itemsize
    flops = 2 * N * HW * 9 * (Cin * Cint + Cint * Cout)
    bytes_accessed = (xf.size * itm + masks.size * itm
                      + (w1t.size + w2t.size) * itm
                      + (b1c.size + b2c.size) * 4
                      + (Cout * N * HW + n_steps * Cout * 2) * 4)

    # TODO(synk): for large H*W, add a spatial row-tile grid axis (2-row halo
    # for the two stacked 3x3s) and budget the per-step footprint at ~20-24 MiB
    # on v7x (64 MiB VMEM); raise vmem_limit_bytes on v5e/v6e before growing
    # tiles past the 16/32 MiB scoped defaults.
    kernel = functools.partial(fused_convblock_kernel, shifts=shifts,
                               compute_dtype=compute_dtype)
    y2, stats = pl.pallas_call(
        kernel,
        out_shape=(
            jax.ShapeDtypeStruct((Cout, N * HW), jnp.float32),
            jax.ShapeDtypeStruct((n_steps, Cout, 2), jnp.float32),
        ),
        grid_spec=pltpu.PrefetchScalarGridSpec(
            num_scalar_prefetch=0,
            grid=(n_steps,),
            in_specs=[
                pl.BlockSpec((Cin, L), lambda i: (0, i)),
                pl.BlockSpec((9, L), lambda i: (0, 0)),            # masks resident
                pl.BlockSpec((9, Cint, Cin), lambda i: (0, 0, 0)),  # weights resident
                pl.BlockSpec((Cint, 1), lambda i: (0, 0)),
                pl.BlockSpec((9, Cout, Cint), lambda i: (0, 0, 0)),
                pl.BlockSpec((Cout, 1), lambda i: (0, 0)),
            ],
            out_specs=[
                pl.BlockSpec((Cout, L), lambda i: (0, i)),
                pl.BlockSpec((1, Cout, 2), lambda i: (i, 0, 0)),
            ],
        ),
        compiler_params=pltpu.CompilerParams(dimension_semantics=("parallel",)),
        cost_estimate=pl.CostEstimate(flops=flops, transcendentals=0,
                                      bytes_accessed=bytes_accessed),
    )(xf, masks, w1t, b1c, w2t, b2c)

    # Fold per-tile BN partials (tiny) into per-channel scale/shift
    # (training-mode batch statistics, biased variance, eps=1e-5).
    # Note: E[x^2]-E[x]^2 in f32 can lose precision for channels with mean >>
    # std at very large N*H*W; the per-tile partial structure supports switching
    # to centered/Welford partials if exact parity at scale is required.
    count = float(N * HW)
    total = jnp.sum(stats, axis=0)                                    # (Cout, 2)
    mean = total[:, 0:1] / count
    var = jnp.maximum(total[:, 1:2] / count - mean * mean, 0.0)
    scale = gamma.reshape(Cout, 1).astype(jnp.float32) * jax.lax.rsqrt(var + BN_EPS)
    shift = beta.reshape(Cout, 1).astype(jnp.float32) - mean * scale

    # Second BN pass: lane-dense FMA, activation buffer aliased in-place.
    # TODO(synk): when n_steps == 1 the stats + apply could be fused into the
    # conv kernel to drop this pass entirely.
    out = pl.pallas_call(
        bn_apply_kernel,
        out_shape=jax.ShapeDtypeStruct((Cout, N * HW), jnp.float32),
        grid_spec=pltpu.PrefetchScalarGridSpec(
            num_scalar_prefetch=0,
            grid=(n_steps,),
            in_specs=[
                pl.BlockSpec((Cout, L), lambda i: (0, i)),
                pl.BlockSpec((Cout, 1), lambda i: (0, 0)),
                pl.BlockSpec((Cout, 1), lambda i: (0, 0)),
            ],
            out_specs=pl.BlockSpec((Cout, L), lambda i: (0, i)),
        ),
        compiler_params=pltpu.CompilerParams(dimension_semantics=("parallel",)),
        input_output_aliases={0: 0},
    )(y2, scale, shift)

    # Back to NCHW (one XLA transpose).
    return jnp.transpose(out.reshape(Cout, N, H, W), (1, 0, 2, 3))


def ref_forward(x_nchw, w1_hwio, b1, w2_hwio, b2, gamma, beta):
    """Pure-JAX reference (mirrors the PyTorch module) for verification."""
    x = jnp.transpose(x_nchw, (0, 2, 3, 1))
    dn = ('NHWC', 'HWIO', 'NHWC')
    y = jax.lax.conv_general_dilated(x, w1_hwio, (1, 1), 'SAME',
                                     dimension_numbers=dn) + b1
    y = jnp.maximum(y, 0.0)
    y = jax.lax.conv_general_dilated(y, w2_hwio, (1, 1), 'SAME',
                                     dimension_numbers=dn) + b2
    y = jnp.maximum(y, 0.0)
    mean = jnp.mean(y, axis=(0, 1, 2))
    var = jnp.mean((y - mean) ** 2, axis=(0, 1, 2))
    y = (y - mean) * jax.lax.rsqrt(var + BN_EPS) * gamma + beta
    return jnp.transpose(y, (0, 3, 1, 2))


if __name__ == "__main__":
    # convBlock(in_c=4, inter_c=8, out_c=4, actfunc=ReLU) at small shapes.
    N, in_c, inter_c, out_c, H, W = 2, 4, 8, 4, 16, 16

    key = jax.random.PRNGKey(0)
    k_x, k_w1, k_b1, k_w2, k_b2 = jax.random.split(key, 5)

    x = jax.random.normal(k_x, (N, in_c, H, W), jnp.float32)                 # NCHW
    w1 = jax.random.normal(k_w1, (3, 3, in_c, inter_c), jnp.float32) * 0.1   # HWIO
    b1 = jax.random.normal(k_b1, (inter_c,), jnp.float32) * 0.1
    w2 = jax.random.normal(k_w2, (3, 3, inter_c, out_c), jnp.float32) * 0.1  # HWIO
    b2 = jax.random.normal(k_b2, (out_c,), jnp.float32) * 0.1
    gamma = jnp.ones((out_c,), jnp.float32)    # BatchNorm2d default weight init
    beta = jnp.zeros((out_c,), jnp.float32)    # BatchNorm2d default bias init

    ref = ref_forward(x, w1, b1, w2, b2, gamma, beta)

    # Exact (f32 MXU) path.
    fwd = jax.jit(conv_block_forward)
    out = jax.block_until_ready(fwd(x, w1, b1, w2, b2, gamma, beta))
    assert out.shape == (N, out_c, H, W)
    np.testing.assert_allclose(np.asarray(out), np.asarray(ref),
                               rtol=1e-4, atol=1e-4)

    # bf16 memory/MXU-input path (worthwhile on v5e/v6e/v7x); f32 accumulation
    # keeps the error to bf16 rounding of inputs/weights/intermediate.
    fwd_bf16 = jax.jit(functools.partial(conv_block_forward,
                                         compute_dtype=jnp.bfloat16))
    out_bf16 = jax.block_until_ready(fwd_bf16(x, w1, b1, w2, b2, gamma, beta))
    np.testing.assert_allclose(np.asarray(out_bf16), np.asarray(ref),
                               rtol=5e-2, atol=5e-2)

    print("KERNEL_OK")
</pallas_src>

<mosaic_0001>
module attributes {stable_mosaic.version = 11 : i64} {
  func.func @bn_apply_kernel(%arg0: i32, %arg1: memref<4x256xf32, #tpu.memory_space<vmem>>, %arg2: memref<4x1xf32, #tpu.memory_space<vmem>>, %arg3: memref<4x1xf32, #tpu.memory_space<vmem>>, %arg4: memref<4x256xf32, #tpu.memory_space<vmem>>) attributes {dimension_semantics = [#tpu.dimension_semantics<parallel>], iteration_bounds = array<i64: 2>, scalar_prefetch = 0 : i64, scratch_operands = 0 : i64, tpu.core_type = #tpu.core_type<tc>, window_params = [{transform_indices = @transform_0, window_bounds = array<i64: 4, 256>}, {pipeline_mode = #tpu.pipeline_mode<synchronous>, transform_indices = @transform_1, window_bounds = array<i64: 4, 1>}, {pipeline_mode = #tpu.pipeline_mode<synchronous>, transform_indices = @transform_2, window_bounds = array<i64: 4, 1>}, {transform_indices = @transform_3, window_bounds = array<i64: 4, 256>}]} {
    %c0 = arith.constant 0 : index
    %c0_0 = arith.constant 0 : index
    %0 = vector.load %arg1[%c0, %c0_0] : memref<4x256xf32, #tpu.memory_space<vmem>>, vector<4x256xf32>
    %c0_1 = arith.constant 0 : index
    %c0_2 = arith.constant 0 : index
    %1 = vector.load %arg2[%c0_1, %c0_2] : memref<4x1xf32, #tpu.memory_space<vmem>>, vector<4x1xf32>
    %2 = vector.broadcast %1 : vector<4x1xf32> to vector<4x256xf32>
    %3 = arith.mulf %0, %2 : vector<4x256xf32>
    %c0_3 = arith.constant 0 : index
    %c0_4 = arith.constant 0 : index
    %4 = vector.load %arg3[%c0_3, %c0_4] : memref<4x1xf32, #tpu.memory_space<vmem>>, vector<4x1xf32>
    %5 = vector.broadcast %4 : vector<4x1xf32> to vector<4x256xf32>
    %6 = arith.addf %3, %5 : vector<4x256xf32>
    %c0_5 = arith.constant 0 : index
    %c0_6 = arith.constant 0 : index
    %7 = vector.load %arg4[%c0_5, %c0_6] : memref<4x256xf32, #tpu.memory_space<vmem>>, vector<4x256xf32>
    tpu.vector_store %arg4[%c0_5, %c0_6], %6 {strides = array<i32>} : memref<4x256xf32, #tpu.memory_space<vmem>>, vector<4x256xf32>,
    return
  }
  func.func @transform_0(%arg0: i32) -> (i32, i32) {
    %c0_i32 = arith.constant 0 : i32
    %c0_i32_0 = arith.constant 0 : i32
    return %c0_i32, %arg0 : i32, i32
  }
  func.func @transform_1(%arg0: i32) -> (i32, i32) {
    %c0_i32 = arith.constant 0 : i32
    %c0_i32_0 = arith.constant 0 : i32
    %c0_i32_1 = arith.constant 0 : i32
    return %c0_i32, %c0_i32_0 : i32, i32
  }
  func.func @transform_2(%arg0: i32) -> (i32, i32) {
    %c0_i32 = arith.constant 0 : i32
    %c0_i32_0 = arith.constant 0 : i32
    %c0_i32_1 = arith.constant 0 : i32
    return %c0_i32, %c0_i32_0 : i32, i32
  }
  func.func @transform_3(%arg0: i32) -> (i32, i32) {
    %c0_i32 = arith.constant 0 : i32
    %c0_i32_0 = arith.constant 0 : i32
    return %c0_i32, %arg0 : i32, i32
  }
}

module attributes {stable_mosaic.version = 11 : i64} {
  func.func @fused_convblock_kernel(%arg0: i32, %arg1: memref<4x256xf32, #tpu.memory_space<vmem>>, %arg2: memref<9x256xf32, #tpu.memory_space<vmem>>, %arg3: memref<9x8x4xf32, #tpu.memory_space<vmem>>, %arg4: memref<8x1xf32, #tpu.memory_space<vmem>>, %arg5: memref<9x4x8xf32, #tpu.memory_space<vmem>>, %arg6: memref<4x1xf32, #tpu.memory_space<vmem>>, %arg7: memref<4x256xf32, #tpu.memory_space<vmem>>, %arg8: memref<1x4x2xf32, #tpu.memory_space<vmem>>) attributes {dimension_semantics = [#tpu.dimension_semantics<parallel>], iteration_bounds = array<i64: 2>, scalar_prefetch = 0 : i64, scratch_operands = 0 : i64, tpu.core_type = #tpu.core_type<tc>, window_params = [{transform_indices = @transform_0, window_bounds = array<i64: 4, 256>}, {pipeline_mode = #tpu.pipeline_mode<synchronous>, transform_indices = @transform_1, window_bounds = array<i64: 9, 256>}, {pipeline_mode = #tpu.pipeline_mode<synchronous>, transform_indices = @transform_2, window_bounds = array<i64: 9, 8, 4>}, {pipeline_mode = #tpu.pipeline_mode<synchronous>, transform_indices = @transform_3, window_bounds = array<i64: 8, 1>}, {pipeline_mode = #tpu.pipeline_mode<synchronous>, transform_indices = @transform_4, window_bounds = array<i64: 9, 4, 8>}, {pipeline_mode = #tpu.pipeline_mode<synchronous>, transform_indices = @transform_5, window_bounds = array<i64: 4, 1>}, {transform_indices = @transform_6, window_bounds = array<i64: 4, 256>}, {transform_indices = @transform_7, window_bounds = array<i64: 1, 4, 2>}]} {
    %c0 = arith.constant 0 : index
    %c0_0 = arith.constant 0 : index
    %0 = vector.load %arg1[%c0, %c0_0] : memref<4x256xf32, #tpu.memory_space<vmem>>, vector<4x256xf32>
    %cst = arith.constant 0.000000e+00 : f32
    %1 = vector.broadcast %cst : f32 to vector<8x256xf32>
    %c17_i32 = arith.constant 17 : i32
    %2 = tpu.dynamic_rotate %0 by %c17_i32 dim 1 : vector<4x256xf32>, i32 -> vector<4x256xf32>
    %c0_1 = arith.constant 0 : index
    %c0_2 = arith.constant 0 : index
    %3 = vector.load %arg2[%c0_1, %c0_2] : memref<9x256xf32, #tpu.memory_space<vmem>>, vector<1x256xf32>
    %4 = vector.broadcast %3 : vector<1x256xf32> to vector<4x256xf32>
    %5 = arith.mulf %2, %4 : vector<4x256xf32>
    %c0_3 = arith.constant 0 : index
    %c0_4 = arith.constant 0 : index
    %c0_5 = arith.constant 0 : index
    %6 = vector.load %arg3[%c0_3, %c0_4, %c0_5] : memref<9x8x4xf32, #tpu.memory_space<vmem>>, vector<1x8x4xf32>
    %7 = vector.shape_cast %6 : vector<1x8x4xf32> to vector<8x4xf32>
    %cst_6 = arith.constant dense<0.000000e+00> : vector<8x256xf32>
    %8 = tpu.matmul %7, %5, %cst_6 {dimension_numbers = #tpu.dot_dimension_numbers<[1], [0], [0], [1], [0, 0, 1, 1], [], []>} : vector<8x4xf32>, vector<4x256xf32>, vector<8x256xf32> -> vector<8x256xf32>
    %9 = arith.addf %1, %8 : vector<8x256xf32>
    %c16_i32 = arith.constant 16 : i32
    %10 = tpu.dynamic_rotate %0 by %c16_i32 dim 1 : vector<4x256xf32>, i32 -> vector<4x256xf32>
    %c1 = arith.constant 1 : index
    %c0_7 = arith.constant 0 : index
    %11 = vector.load %arg2[%c1, %c0_7] : memref<9x256xf32, #tpu.memory_space<vmem>>, vector<1x256xf32>
    %12 = vector.broadcast %11 : vector<1x256xf32> to vector<4x256xf32>
    %13 = arith.mulf %10, %12 : vector<4x256xf32>
    %c1_8 = arith.constant 1 : index
    %c0_9 = arith.constant 0 : index
    %c0_10 = arith.constant 0 : index
    %14 = vector.load %arg3[%c1_8, %c0_9, %c0_10] : memref<9x8x4xf32, #tpu.memory_space<vmem>>, vector<1x8x4xf32>
    %15 = vector.shape_cast %14 : vector<1x8x4xf32> to vector<8x4xf32>
    %cst_11 = arith.constant dense<0.000000e+00> : vector<8x256xf32>
    %16 = tpu.matmul %15, %13, %cst_11 {dimension_numbers = #tpu.dot_dimension_numbers<[1], [0], [0], [1], [0, 0, 1, 1], [], []>} : vector<8x4xf32>, vector<4x256xf32>, vector<8x256xf32> -> vector<8x256xf32>
    %17 = arith.addf %9, %16 : vector<8x256xf32>
    %c15_i32 = arith.constant 15 : i32
    %18 = tpu.dynamic_rotate %0 by %c15_i32 dim 1 : vector<4x256xf32>, i32 -> vector<4x256xf32>
    %c2 = arith.constant 2 : index
    %c0_12 = arith.constant 0 : index
    %19 = vector.load %arg2[%c2, %c0_12] : memref<9x256xf32, #tpu.memory_space<vmem>>, vector<1x256xf32>
    %20 = vector.broadcast %19 : vector<1x256xf32> to vector<4x256xf32>
    %21 = arith.mulf %18, %20 : vector<4x256xf32>
    %c2_13 = arith.constant 2 : index
    %c0_14 = arith.constant 0 : index
    %c0_15 = arith.constant 0 : index
    %22 = vector.load %arg3[%c2_13, %c0_14, %c0_15] : memref<9x8x4xf32, #tpu.memory_space<vmem>>, vector<1x8x4xf32>
    %23 = vector.shape_cast %22 : vector<1x8x4xf32> to vector<8x4xf32>
    %cst_16 = arith.constant dense<0.000000e+00> : vector<8x256xf32>
    %24 = tpu.matmul %23, %21, %cst_16 {dimension_numbers = #tpu.dot_dimension_numbers<[1], [0], [0], [1], [0, 0, 1, 1], [], []>} : vector<8x4xf32>, vector<4x256xf32>, vector<8x256xf32> -> vector<8x256xf32>
    %25 = arith.addf %17, %24 : vector<8x256xf32>
    %c1_i32 = arith.constant 1 : i32
    %26 = tpu.dynamic_rotate %0 by %c1_i32 dim 1 : vector<4x256xf32>, i32 -> vector<4x256xf32>
    %c3 = arith.constant 3 : index
    %c0_17 = arith.constant 0 : index
    %27 = vector.load %arg2[%c3, %c0_17] : memref<9x256xf32, #tpu.memory_space<vmem>>, vector<1x256xf32>
    %28 = vector.broadcast %27 : vector<1x256xf32> to vector<4x256xf32>
    %29 = arith.mulf %26, %28 : vector<4x256xf32>
    %c3_18 = arith.constant 3 : index
    %c0_19 = arith.constant 0 : index
    %c0_20 = arith.constant 0 : index
    %30 = vector.load %arg3[%c3_18, %c0_19, %c0_20] : memref<9x8x4xf32, #tpu.memory_space<vmem>>, vector<1x8x4xf32>
    %31 = vector.shape_cast %30 : vector<1x8x4xf32> to vector<8x4xf32>
    %cst_21 = arith.constant dense<0.000000e+00> : vector<8x256xf32>
    %32 = tpu.matmul %31, %29, %cst_21 {dimension_numbers = #tpu.dot_dimension_numbers<[1], [0], [0], [1], [0, 0, 1, 1], [], []>} : vector<8x4xf32>, vector<4x256xf32>, vector<8x256xf32> -> vector<8x256xf32>
    %33 = arith.addf %25, %32 : vector<8x256xf32>
    %c4 = arith.constant 4 : index
    %c0_22 = arith.constant 0 : index
    %c0_23 = arith.constant 0 : index
    %34 = vector.load %arg3[%c4, %c0_22, %c0_23] : memref<9x8x4xf32, #tpu.memory_space<vmem>>, vector<1x8x4xf32>
    %35 = vector.shape_cast %34 : vector<1x8x4xf32> to vector<8x4xf32>
    %cst_24 = arith.constant dense<0.000000e+00> : vector<8x256xf32>
    %36 = tpu.matmul %35, %0, %cst_24 {dimension_numbers = #tpu.dot_dimension_numbers<[1], [0], [0], [1], [0, 0, 1, 1], [], []>} : vector<8x4xf32>, vector<4x256xf32>, vector<8x256xf32> -> vector<8x256xf32>
    %37 = arith.addf %33, %36 : vector<8x256xf32>
    %c255_i32 = arith.constant 255 : i32
    %38 = tpu.dynamic_rotate %0 by %c255_i32 dim 1 : vector<4x256xf32>, i32 -> vector<4x256xf32>
    %c5 = arith.constant 5 : index
    %c0_25 = arith.constant 0 : index
    %39 = vector.load %arg2[%c5, %c0_25] : memref<9x256xf32, #tpu.memory_space<vmem>>, vector<1x256xf32>
    %40 = vector.broadcast %39 : vector<1x256xf32> to vector<4x256xf32>
    %41 = arith.mulf %38, %40 : vector<4x256xf32>
    %c5_26 = arith.constant 5 : index
    %c0_27 = arith.constant 0 : index
    %c0_28 = arith.constant 0 : index
    %42 = vector.load %arg3[%c5_26, %c0_27, %c0_28] : memref<9x8x4xf32, #tpu.memory_space<vmem>>, vector<1x8x4xf32>
    %43 = vector.shape_cast %42 : vector<1x8x4xf32> to vector<8x4xf32>
    %cst_29 = arith.constant dense<0.000000e+00> : vector<8x256xf32>
    %44 = tpu.matmul %43, %41, %cst_29 {dimension_numbers = #tpu.dot_dimension_numbers<[1], [0], [0], [1], [0, 0, 1, 1], [], []>} : vector<8x4xf32>, vector<4x256xf32>, vector<8x256xf32> -> vector<8x256xf32>
    %45 = arith.addf %37, %44 : vector<8x256xf32>
    %c241_i32 = arith.constant 241 : i32
    %46 = tpu.dynamic_rotate %0 by %c241_i32 dim 1 : vector<4x256xf32>, i32 -> vector<4x256xf32>
    %c6 = arith.constant 6 : index
    %c0_30 = arith.constant 0 : index
    %47 = vector.load %arg2[%c6, %c0_30] : memref<9x256xf32, #tpu.memory_space<vmem>>, vector<1x256xf32>
    %48 = vector.broadcast %47 : vector<1x256xf32> to vector<4x256xf32>
    %49 = arith.mulf %46, %48 : vector<4x256xf32>
    %c6_31 = arith.constant 6 : index
    %c0_32 = arith.constant 0 : index
    %c0_33 = arith.constant 0 : index
    %50 = vector.load %arg3[%c6_31, %c0_32, %c0_33] : memref<9x8x4xf32, #tpu.memory_space<vmem>>, vector<1x8x4xf32>
    %51 = vector.shape_cast %50 : vector<1x8x4xf32> to vector<8x4xf32>
    %cst_34 = arith.constant dense<0.000000e+00> : vector<8x256xf32>
    %52 = tpu.matmul %51, %49, %cst_34 {dimension_numbers = #tpu.dot_dimension_numbers<[1], [0], [0], [1], [0, 0, 1, 1], [], []>} : vector<8x4xf32>, vector<4x256xf32>, vector<8x256xf32> -> vector<8x256xf32>
    %53 = arith.addf %45, %52 : vector<8x256xf32>
    %c240_i32 = arith.constant 240 : i32
    %54 = tpu.dynamic_rotate %0 by %c240_i32 dim 1 : vector<4x256xf32>, i32 -> vector<4x256xf32>
    %c7 = arith.constant 7 : index
    %c0_35 = arith.constant 0 : index
    %55 = vector.load %arg2[%c7, %c0_35] : memref<9x256xf32, #tpu.memory_space<vmem>>, vector<1x256xf32>
    %56 = vector.broadcast %55 : vector<1x256xf32> to vector<4x256xf32>
    %57 = arith.mulf %54, %56 : vector<4x256xf32>
    %c7_36 = arith.constant 7 : index
    %c0_37 = arith.constant 0 : index
    %c0_38 = arith.constant 0 : index
    %58 = vector.load %arg3[%c7_36, %c0_37, %c0_38] : memref<9x8x4xf32, #tpu.memory_space<vmem>>, vector<1x8x4xf32>
    %59 = vector.shape_cast %58 : vector<1x8x4xf32> to vector<8x4xf32>
    %cst_39 = arith.constant dense<0.000000e+00> : vector<8x256xf32>
    %60 = tpu.matmul %59, %57, %cst_39 {dimension_numbers = #tpu.dot_dimension_numbers<[1], [0], [0], [1], [0, 0, 1, 1], [], []>} : vector<8x4xf32>, vector<4x256xf32>, vector<8x256xf32> -> vector<8x256xf32>
    %61 = arith.addf %53, %60 : vector<8x256xf32>
    %c239_i32 = arith.constant 239 : i32
    %62 = tpu.dynamic_rotate %0 by %c239_i32 dim 1 : vector<4x256xf32>, i32 -> vector<4x256xf32>
    %c8 = arith.constant 8 : index
    %c0_40 = arith.constant 0 : index
    %63 = vector.load %arg2[%c8, %c0_40] : memref<9x256xf32, #tpu.memory_space<vmem>>, vector<1x256xf32>
    %64 = vector.broadcast %63 : vector<1x256xf32> to vector<4x256xf32>
    %65 = arith.mulf %62, %64 : vector<4x256xf32>
    %c8_41 = arith.constant 8 : index
    %c0_42 = arith.constant 0 : index
    %c0_43 = arith.constant 0 : index
    %66 = vector.load %arg3[%c8_41, %c0_42, %c0_43] : memref<9x8x4xf32, #tpu.memory_space<vmem>>, vector<1x8x4xf32>
    %67 = vector.shape_cast %66 : vector<1x8x4xf32> to vector<8x4xf32>
    %cst_44 = arith.constant dense<0.000000e+00> : vector<8x256xf32>
    %68 = tpu.matmul %67, %65, %cst_44 {dimension_numbers = #tpu.dot_dimension_numbers<[1], [0], [0], [1], [0, 0, 1, 1], [], []>} : vector<8x4xf32>, vector<4x256xf32>, vector<8x256xf32> -> vector<8x256xf32>
    %69 = arith.addf %61, %68 : vector<8x256xf32>
    %c0_45 = arith.constant 0 : index
    %c0_46 = arith.constant 0 : index
    %70 = vector.load %arg4[%c0_45, %c0_46] : memref<8x1xf32, #tpu.memory_space<vmem>>, vector<8x1xf32>
    %71 = vector.broadcast %70 : vector<8x1xf32> to vector<8x256xf32>
    %72 = arith.addf %69, %71 : vector<8x256xf32>
    %cst_47 = arith.constant 0.000000e+00 : f32
    %73 = vector.broadcast %cst_47 : f32 to vector<8x256xf32>
    %74 = arith.maximumf %72, %73 : vector<8x256xf32>
    %cst_48 = arith.constant 0.000000e+00 : f32
    %75 = vector.broadcast %cst_48 : f32 to vector<4x256xf32>
    %c17_i32_49 = arith.constant 17 : i32
    %76 = tpu.dynamic_rotate %74 by %c17_i32_49 dim 1 : vector<8x256xf32>, i32 -> vector<8x256xf32>
    %c0_50 = arith.constant 0 : index
    %c0_51 = arith.constant 0 : index
    %77 = vector.load %arg2[%c0_50, %c0_51] : memref<9x256xf32, #tpu.memory_space<vmem>>, vector<1x256xf32>
    %78 = vector.broadcast %77 : vector<1x256xf32> to vector<8x256xf32>
    %79 = arith.mulf %76, %78 : vector<8x256xf32>
    %c0_52 = arith.constant 0 : index
    %c0_53 = arith.constant 0 : index
    %c0_54 = arith.constant 0 : index
    %80 = vector.load %arg5[%c0_52, %c0_53, %c0_54] : memref<9x4x8xf32, #tpu.memory_space<vmem>>, vector<1x4x8xf32>
    %81 = vector.shape_cast %80 : vector<1x4x8xf32> to vector<4x8xf32>
    %cst_55 = arith.constant dense<0.000000e+00> : vector<4x256xf32>
    %82 = tpu.matmul %81, %79, %cst_55 {dimension_numbers = #tpu.dot_dimension_numbers<[1], [0], [0], [1], [0, 0, 1, 1], [], []>} : vector<4x8xf32>, vector<8x256xf32>, vector<4x256xf32> -> vector<4x256xf32>
    %83 = arith.addf %75, %82 : vector<4x256xf32>
    %c16_i32_56 = arith.constant 16 : i32
    %84 = tpu.dynamic_rotate %74 by %c16_i32_56 dim 1 : vector<8x256xf32>, i32 -> vector<8x256xf32>
    %c1_57 = arith.constant 1 : index
    %c0_58 = arith.constant 0 : index
    %85 = vector.load %arg2[%c1_57, %c0_58] : memref<9x256xf32, #tpu.memory_space<vmem>>, vector<1x256xf32>
    %86 = vector.broadcast %85 : vector<1x256xf32> to vector<8x256xf32>
    %87 = arith.mulf %84, %86 : vector<8x256xf32>
    %c1_59 = arith.constant 1 : index
    %c0_60 = arith.constant 0 : index
    %c0_61 = arith.constant 0 : index
    %88 = vector.load %arg5[%c1_59, %c0_60, %c0_61] : memref<9x4x8xf32, #tpu.memory_space<vmem>>, vector<1x4x8xf32>
    %89 = vector.shape_cast %88 : vector<1x4x8xf32> to vector<4x8xf32>
    %cst_62 = arith.constant dense<0.000000e+00> : vector<4x256xf32>
    %90 = tpu.matmul %89, %87, %cst_62 {dimension_numbers = #tpu.dot_dimension_numbers<[1], [0], [0], [1], [0, 0, 1, 1], [], []>} : vector<4x8xf32>, vector<8x256xf32>, vector<4x256xf32> -> vector<4x256xf32>
    %91 = arith.addf %83, %90 : vector<4x256xf32>
    %c15_i32_63 = arith.constant 15 : i32
    %92 = tpu.dynamic_rotate %74 by %c15_i32_63 dim 1 : vector<8x256xf32>, i32 -> vector<8x256xf32>
    %c2_64 = arith.constant 2 : index
    %c0_65 = arith.constant 0 : index
    %93 = vector.load %arg2[%c2_64, %c0_65] : memref<9x256xf32, #tpu.memory_space<vmem>>, vector<1x256xf32>
    %94 = vector.broadcast %93 : vector<1x256xf32> to vector<8x256xf32>
    %95 = arith.mulf %92, %94 : vector<8x256xf32>
    %c2_66 = arith.constant 2 : index
    %c0_67 = arith.constant 0 : index
    %c0_68 = arith.constant 0 : index
    %96 = vector.load %arg5[%c2_66, %c0_67, %c0_68] : memref<9x4x8xf32, #tpu.memory_space<vmem>>, vector<1x4x8xf32>
    %97 = vector.shape_cast %96 : vector<1x4x8xf32> to vector<4x8xf32>
    %cst_69 = arith.constant dense<0.000000e+00> : vector<4x256xf32>
    %98 = tpu.matmul %97, %95, %cst_69 {dimension_numbers = #tpu.dot_dimension_numbers<[1], [0], [0], [1], [0, 0, 1, 1], [], []>} : vector<4x8xf32>, vector<8x256xf32>, vector<4x256xf32> -> vector<4x256xf32>
    %99 = arith.addf %91, %98 : vector<4x256xf32>
    %c1_i32_70 = arith.constant 1 : i32
    %100 = tpu.dynamic_rotate %74 by %c1_i32_70 dim 1 : vector<8x256xf32>, i32 -> vector<8x256xf32>
    %c3_71 = arith.constant 3 : index
    %c0_72 = arith.constant 0 : index
    %101 = vector.load %arg2[%c3_71, %c0_72] : memref<9x256xf32, #tpu.memory_space<vmem>>, vector<1x256xf32>
    %102 = vector.broadcast %101 : vector<1x256xf32> to vector<8x256xf32>
    %103 = arith.mulf %100, %102 : vector<8x256xf32>
    %c3_73 = arith.constant 3 : index
    %c0_74 = arith.constant 0 : index
    %c0_75 = arith.constant 0 : index
    %104 = vector.load %arg5[%c3_73, %c0_74, %c0_75] : memref<9x4x8xf32, #tpu.memory_space<vmem>>, vector<1x4x8xf32>
    %105 = vector.shape_cast %104 : vector<1x4x8xf32> to vector<4x8xf32>
    %cst_76 = arith.constant dense<0.000000e+00> : vector<4x256xf32>
    %106 = tpu.matmul %105, %103, %cst_76 {dimension_numbers = #tpu.dot_dimension_numbers<[1], [0], [0], [1], [0, 0, 1, 1], [], []>} : vector<4x8xf32>, vector<8x256xf32>, vector<4x256xf32> -> vector<4x256xf32>
    %107 = arith.addf %99, %106 : vector<4x256xf32>
    %c4_77 = arith.constant 4 : index
    %c0_78 = arith.constant 0 : index
    %c0_79 = arith.constant 0 : index
    %108 = vector.load %arg5[%c4_77, %c0_78, %c0_79] : memref<9x4x8xf32, #tpu.memory_space<vmem>>, vector<1x4x8xf32>
    %109 = vector.shape_cast %108 : vector<1x4x8xf32> to vector<4x8xf32>
    %cst_80 = arith.constant dense<0.000000e+00> : vector<4x256xf32>
    %110 = tpu.matmul %109, %74, %cst_80 {dimension_numbers = #tpu.dot_dimension_numbers<[1], [0], [0], [1], [0, 0, 1, 1], [], []>} : vector<4x8xf32>, vector<8x256xf32>, vector<4x256xf32> -> vector<4x256xf32>
    %111 = arith.addf %107, %110 : vector<4x256xf32>
    %c255_i32_81 = arith.constant 255 : i32
    %112 = tpu.dynamic_rotate %74 by %c255_i32_81 dim 1 : vector<8x256xf32>, i32 -> vector<8x256xf32>
    %c5_82 = arith.constant 5 : index
    %c0_83 = arith.constant 0 : index
    %113 = vector.load %arg2[%c5_82, %c0_83] : memref<9x256xf32, #tpu.memory_space<vmem>>, vector<1x256xf32>
    %114 = vector.broadcast %113 : vector<1x256xf32> to vector<8x256xf32>
    %115 = arith.mulf %112, %114 : vector<8x256xf32>
    %c5_84 = arith.constant 5 : index
    %c0_85 = arith.constant 0 : index
    %c0_86 = arith.constant 0 : index
    %116 = vector.load %arg5[%c5_84, %c0_85, %c0_86] : memref<9x4x8xf32, #tpu.memory_space<vmem>>, vector<1x4x8xf32>
    %117 = vector.shape_cast %116 : vector<1x4x8xf32> to vector<4x8xf32>
    %cst_87 = arith.constant dense<0.000000e+00> : vector<4x256xf32>
    %118 = tpu.matmul %117, %115, %cst_87 {dimension_numbers = #tpu.dot_dimension_numbers<[1], [0], [0], [1], [0, 0, 1, 1], [], []>} : vector<4x8xf32>, vector<8x256xf32>, vector<4x256xf32> -> vector<4x256xf32>
    %119 = arith.addf %111, %118 : vector<4x256xf32>
    %c241_i32_88 = arith.constant 241 : i32
    %120 = tpu.dynamic_rotate %74 by %c241_i32_88 dim 1 : vector<8x256xf32>, i32 -> vector<8x256xf32>
    %c6_89 = arith.constant 6 : index
    %c0_90 = arith.constant 0 : index
    %121 = vector.load %arg2[%c6_89, %c0_90] : memref<9x256xf32, #tpu.memory_space<vmem>>, vector<1x256xf32>
    %122 = vector.broadcast %121 : vector<1x256xf32> to vector<8x256xf32>
    %123 = arith.mulf %120, %122 : vector<8x256xf32>
    %c6_91 = arith.constant 6 : index
    %c0_92 = arith.constant 0 : index
    %c0_93 = arith.constant 0 : index
    %124 = vector.load %arg5[%c6_91, %c0_92, %c0_93] : memref<9x4x8xf32, #tpu.memory_space<vmem>>, vector<1x4x8xf32>
    %125 = vector.shape_cast %124 : vector<1x4x8xf32> to vector<4x8xf32>
    %cst_94 = arith.constant dense<0.000000e+00> : vector<4x256xf32>
    %126 = tpu.matmul %125, %123, %cst_94 {dimension_numbers = #tpu.dot_dimension_numbers<[1], [0], [0], [1], [0, 0, 1, 1], [], []>} : vector<4x8xf32>, vector<8x256xf32>, vector<4x256xf32> -> vector<4x256xf32>
    %127 = arith.addf %119, %126 : vector<4x256xf32>
    %c240_i32_95 = arith.constant 240 : i32
    %128 = tpu.dynamic_rotate %74 by %c240_i32_95 dim 1 : vector<8x256xf32>, i32 -> vector<8x256xf32>
    %c7_96 = arith.constant 7 : index
    %c0_97 = arith.constant 0 : index
    %129 = vector.load %arg2[%c7_96, %c0_97] : memref<9x256xf32, #tpu.memory_space<vmem>>, vector<1x256xf32>
    %130 = vector.broadcast %129 : vector<1x256xf32> to vector<8x256xf32>
    %131 = arith.mulf %128, %130 : vector<8x256xf32>
    %c7_98 = arith.constant 7 : index
    %c0_99 = arith.constant 0 : index
    %c0_100 = arith.constant 0 : index
    %132 = vector.load %arg5[%c7_98, %c0_99, %c0_100] : memref<9x4x8xf32, #tpu.memory_space<vmem>>, vector<1x4x8xf32>
    %133 = vector.shape_cast %132 : vector<1x4x8xf32> to vector<4x8xf32>
    %cst_101 = arith.constant dense<0.000000e+00> : vector<4x256xf32>
    %134 = tpu.matmul %133, %131, %cst_101 {dimension_numbers = #tpu.dot_dimension_numbers<[1], [0], [0], [1], [0, 0, 1, 1], [], []>} : vector<4x8xf32>, vector<8x256xf32>, vector<4x256xf32> -> vector<4x256xf32>
    %135 = arith.addf %127, %134 : vector<4x256xf32>
    %c239_i32_102 = arith.constant 239 : i32
    %136 = tpu.dynamic_rotate %74 by %c239_i32_102 dim 1 : vector<8x256xf32>, i32 -> vector<8x256xf32>
    %c8_103 = arith.constant 8 : index
    %c0_104 = arith.constant 0 : index
    %137 = vector.load %arg2[%c8_103, %c0_104] : memref<9x256xf32, #tpu.memory_space<vmem>>, vector<1x256xf32>
    %138 = vector.broadcast %137 : vector<1x256xf32> to vector<8x256xf32>
    %139 = arith.mulf %136, %138 : vector<8x256xf32>
    %c8_105 = arith.constant 8 : index
    %c0_106 = arith.constant 0 : index
    %c0_107 = arith.constant 0 : index
    %140 = vector.load %arg5[%c8_105, %c0_106, %c0_107] : memref<9x4x8xf32, #tpu.memory_space<vmem>>, vector<1x4x8xf32>
    %141 = vector.shape_cast %140 : vector<1x4x8xf32> to vector<4x8xf32>
    %cst_108 = arith.constant dense<0.000000e+00> : vector<4x256xf32>
    %142 = tpu.matmul %141, %139, %cst_108 {dimension_numbers = #tpu.dot_dimension_numbers<[1], [0], [0], [1], [0, 0, 1, 1], [], []>} : vector<4x8xf32>, vector<8x256xf32>, vector<4x256xf32> -> vector<4x256xf32>
    %143 = arith.addf %135, %142 : vector<4x256xf32>
    %c0_109 = arith.constant 0 : index
    %c0_110 = arith.constant 0 : index
    %144 = vector.load %arg6[%c0_109, %c0_110] : memref<4x1xf32, #tpu.memory_space<vmem>>, vector<4x1xf32>
    %145 = vector.broadcast %144 : vector<4x1xf32> to vector<4x256xf32>
    %146 = arith.addf %143, %145 : vector<4x256xf32>
    %cst_111 = arith.constant 0.000000e+00 : f32
    %147 = vector.broadcast %cst_111 : f32 to vector<4x256xf32>
    %148 = arith.maximumf %146, %147 : vector<4x256xf32>
    %c0_112 = arith.constant 0 : index
    %c0_113 = arith.constant 0 : index
    %149 = vector.load %arg7[%c0_112, %c0_113] : memref<4x256xf32, #tpu.memory_space<vmem>>, vector<4x256xf32>
    tpu.vector_store %arg7[%c0_112, %c0_113], %148 {strides = array<i32>} : memref<4x256xf32, #tpu.memory_space<vmem>>, vector<4x256xf32>,
    %cst_114 = arith.constant dense<0.000000e+00> : vector<4xf32>
    %150 = vector.multi_reduction <add>, %148, %cst_114 [1] : vector<4x256xf32> to vector<4xf32>
    %151 = vector.shape_cast %150 : vector<4xf32> to vector<4x1xf32>
    %152 = arith.mulf %148, %148 : vector<4x256xf32>
    %cst_115 = arith.constant dense<0.000000e+00> : vector<4xf32>
    %153 = vector.multi_reduction <add>, %152, %cst_115 [1] : vector<4x256xf32> to vector<4xf32>
    %154 = vector.shape_cast %153 : vector<4xf32> to vector<4x1xf32>
    %155 = tpu.concatenate %151, %154 in 1 : vector<4x1xf32>, vector<4x1xf32> -> vector<4x2xf32>
    %c0_116 = arith.constant 0 : index
    %c0_117 = arith.constant 0 : index
    %c0_118 = arith.constant 0 : index
    %156 = vector.load %arg8[%c0_116, %c0_117, %c0_118] : memref<1x4x2xf32, #tpu.memory_space<vmem>>, vector<1x4x2xf32>
    %157 = vector.shape_cast %156 : vector<1x4x2xf32> to vector<4x2xf32>
    %158 = vector.shape_cast %155 : vector<4x2xf32> to vector<1x4x2xf32>
    tpu.vector_store %arg8[%c0_116, %c0_117, %c0_118], %158 {strides = array<i32>} : memref<1x4x2xf32, #tpu.memory_space<vmem>>, vector<1x4x2xf32>,
    return
  }
  func.func @transform_0(%arg0: i32) -> (i32, i32) {
    %c0_i32 = arith.constant 0 : i32
    %c0_i32_0 = arith.constant 0 : i32
    return %c0_i32, %arg0 : i32, i32
  }
  func.func @transform_1(%arg0: i32) -> (i32, i32) {
    %c0_i32 = arith.constant 0 : i32
    %c0_i32_0 = arith.constant 0 : i32
    %c0_i32_1 = arith.constant 0 : i32
    return %c0_i32, %c0_i32_0 : i32, i32
  }
  func.func @transform_2(%arg0: i32) -> (i32, i32, i32) {
    %c0_i32 = arith.constant 0 : i32
    %c0_i32_0 = arith.constant 0 : i32
    %c0_i32_1 = arith.constant 0 : i32
    %c0_i32_2 = arith.constant 0 : i32
    return %c0_i32, %c0_i32_0, %c0_i32_1 : i32, i32, i32
  }
  func.func @transform_3(%arg0: i32) -> (i32, i32) {
    %c0_i32 = arith.constant 0 : i32
    %c0_i32_0 = arith.constant 0 : i32
    %c0_i32_1 = arith.constant 0 : i32
    return %c0_i32, %c0_i32_0 : i32, i32
  }
  func.func @transform_4(%arg0: i32) -> (i32, i32, i32) {
    %c0_i32 = arith.constant 0 : i32
    %c0_i32_0 = arith.constant 0 : i32
    %c0_i32_1 = arith.constant 0 : i32
    %c0_i32_2 = arith.constant 0 : i32
    return %c0_i32, %c0_i32_0, %c0_i32_1 : i32, i32, i32
  }
  func.func @transform_5(%arg0: i32) -> (i32, i32) {
    %c0_i32 = arith.constant 0 : i32
    %c0_i32_0 = arith.constant 0 : i32
    %c0_i32_1 = arith.constant 0 : i32
    return %c0_i32, %c0_i32_0 : i32, i32
  }
  func.func @transform_6(%arg0: i32) -> (i32, i32) {
    %c0_i32 = arith.constant 0 : i32
    %c0_i32_0 = arith.constant 0 : i32
    return %c0_i32, %arg0 : i32, i32
  }
  func.func @transform_7(%arg0: i32) -> (i32, i32, i32) {
    %c0_i32 = arith.constant 0 : i32
    %c0_i32_0 = arith.constant 0 : i32
    %c0_i32_1 = arith.constant 0 : i32
    return %arg0, %c0_i32, %c0_i32_0 : i32, i32, i32
  }
}

</mosaic_0001>

<bundles_post_ra>
// kernel: conv_block_forward.3
= control target key start
LH: loop header
LB: loop body
LE: loop exit
PB: predicated region body
PF: predicated region fallthrough
CT: control target
= control target key end

     0   :  { %s312_s12 = smov 0   ;;  %s335_s0 = inlined_call_operand.vmem [shape: f32[4,512], index: 0, kind: input, shape index: {}, may-alias: {0,3}]   ;;  %s336_s1 = inlined_call_operand.vmem [shape: f32[4,1], index: 1, kind: input, shape index: {}]   ;;  %s337_s2 = inlined_call_operand.vmem [shape: f32[4,1], index: 2, kind: input, shape index: {}]   ;;  %s338_s3 = inlined_call_operand.vmem [shape: f32[4,512], index: 3, kind: output, shape index: {}, may-alias: {0,3}]  }
   0x1 LB: > { %s260_s13 = sadd.s32 4294967295, %s288_s12   ;;  %p264_p0 = scmp.ge.s32.totalorder %s288_s12, 1  ;;  %s288_s12 = sphi %s312_s12, %s13_s12  }
   0x2   : > { %p138_p1 = scmp.lt.s32.totalorder %s288_s12, 3 }
   0x4   : > { %p139_p2 = pnand %p264_p0, %p138_p1 }
   0x5   : > { %s265_s18 = sshll.u32 (!%p139_p2), %s260_s13, 1 }
   0x6   : > { %142 = sbr.rel (%p139_p2) target bundleno = 146 (0x92), region = 32  ;;  %p163_p3 = scmp.lt.s32.totalorder (!%p139_p2), %s265_s18, 3 }
   0xb   : > { %v175_v0 = vld [vmem:[%s336_s1] sm:$0xf]  ;;  %v290_v1 = vmov 0   ;;  %v291_v3 = vmov 839922192   ;;  %v183_v5 = vlaneseq  ;;  %s340_s18 = smov (!%p163_p3, %s265_s18), 3 }
   0xc   : > { %281 = vset.pattern.permute.xlu0 %v290_v1  ;;  %v189_v2 = vld [vmem:[%s337_s2] sm:$0xf]  ;;  %v181_v4 = vunpack.c.l.s4 %v291_v3  ;;  %s266_s19 = sshll.u32 %s340_s18, 2 }
   0xd   : > { %178 = vperm.xlu0 %281, %v175_v0   ;;  %v184_v7 = vshrl.u32 %v183_v5, 7  ;;  %s166_s22 = scalar_lea.vmem %s335_s0, %s266_s19  ;;  %s172_s25 = scalar_lea.vmem %s338_s3, %s266_s19 }
   0xe   : > { %v182_v6 = vunpack.c.0.s8 %v181_v4  ;;  %v174_v11 = vld [vmem:[%s166_s22] sm:$0xff] }
  0x10   : > { %v185_v8 = vsub.s32 %v182_v6, %v184_v7 }
  0x11   : > { %192 = vperm.xlu0 %281, %v189_v2  }
  0x88   : > { %v179_v9 = vpop.permute.xlu0 %178 }
  0x89   : > { %v186_v10 = vrot.slane %v179_v9, %v185_v8 }
  0x8b   : > { %v188_v13 = vmul.f32 %v186_v10, %v174_v11 }
  0x8c   : > { %v193_v12 = vpop.permute.xlu0 %192 }
  0x8d   : > { %v200_v14 = vrot.slane %v193_v12, %v185_v8 }
  0x8f   : > { %v202_v15 = vadd.f32 %v200_v14, %v188_v13 }
  0x91   : > { %203 = vst [vmem:[%s172_s25] sm:$0xff] %v202_v15 }
  0x92 PF: > { %s13_s12 = sadd.s32 1, %s288_s12  }
  0x93   : > { %p10_p4 = scmp.ge.s32.totalorder %s13_s12, 4  }
  0x95   :  { %12 = sbr.rel (!%p10_p4) target bundleno = 1 (0x1), region = 62 }

// kernel: conv_block_forward.2
= control target key start
LH: loop header
LB: loop body
LE: loop exit
PB: predicated region body
PF: predicated region fallthrough
CT: control target
= control target key end

     0   :  { %s2264_s24 = smov 0   ;;  %s2652_s0 = inlined_call_operand.vmem [shape: f32[4,512], index: 0, kind: input, shape index: {}]   ;;  %s2653_s1 = inlined_call_operand.vmem [shape: f32[9,256], index: 1, kind: input, shape index: {}]   ;;  %s2654_s2 = inlined_call_operand.vmem [shape: f32[9,8,4], index: 2, kind: input, shape index: {}]   ;;  %s2655_s3 = inlined_call_operand.vmem [shape: f32[8,1], index: 3, kind: input, shape index: {}]   ;;  %s2656_s4 = inlined_call_operand.vmem [shape: f32[9,4,8], index: 4, kind: input, shape index: {}]   ;;  %s2657_s5 = inlined_call_operand.vmem [shape: f32[4,1], index: 5, kind: input, shape index: {}]   ;;  %s2658_s6 = inlined_call_operand.vmem [shape: f32[4,512], index: 6, kind: output, shape index: {0}]   ;;  %s2659_s7 = inlined_call_operand.vmem [shape: f32[2,4,2], index: 7, kind: output, shape index: {1}]  }
   0x1 LB: > { %s2270_s25 = sadd.s32 4294967295, %s2212_s24   ;;  %p2119_p0 = scmp.ge.s32.totalorder %s2212_s24, 1  ;;  %s2212_s24 = sphi %s2264_s24, %s18_s24  }
   0x2   : > { %p241_p1 = scmp.lt.s32.totalorder %s2212_s24, 3 }
   0x4   : > { %p242_p2 = pnand %p2119_p0, %p241_p1 }
   0x5   : > { %s2120_s26 = sshll.u32 (!%p242_p2), %s2270_s25, 1  ;;  %s2214_s8 = smov (!%p242_p2), 17  }
   0x6   : > { %245 = sbr.rel (%p242_p2) target bundleno = 860 (0x35c), region = 44  ;;  %p278_p3 = scmp.lt.s32.totalorder (!%p242_p2), %s2120_s26, 3 }
   0x7   : > { %s2215_s9 = smov (!%p242_p2), 16   ;;  %s2217_s10 = smov (!%p242_p2), 15  }
   0x8   : > { %s2218_s11 = smov (!%p242_p2), 1   ;;  %s2219_s12 = smov (!%p242_p2), 127  }
   0x9   : > { %s2220_s13 = smov (!%p242_p2), 113   ;;  %s2222_s14 = smov (!%p242_p2), 112  }
   0xa   : > { %s2223_s15 = smov (!%p242_p2), 111   ;;  %p289_p4 = scmp.lt.s32.totalorder (!%p242_p2), %s2270_s25, 1 }
   0xb   : > { %s2661_s26 = smov (!%p278_p3, %s2120_s26), 3  ;;  %v2216_v2 = vmov 0.0   ;;  %v2221_v3 = vmov 0   ;;  %v1225_v4 = vld [vmem:[%s2655_s3] sm:$0xff]  ;;  %v301_v5 = vlaneseq  ;;  %vm349_vm1 = vcmask 1043456   ;;  %v2126_v40 = vld [vmem:[%s2654_s2 + $0x8] sm:$0xff] }
   0xc   : > { %s2121_s27 = sshll.u32 %s2661_s26, 2  ;;  %420 = vmatprep.mubr.f32.mxu0 %v2216_v2  ;;  %500 = vmatprep.mubr.f32.mxu1 %v2216_v2  ;;  %v306_v10 = vld [vmem:[%s2653_s1] ss:$8 sm:$0x3]  ;;  %vm345_vm5 = vcmask 31744   ;;  %v2134_v52 = vld [vmem:[%s2654_s2 + $0x10] sm:$0xff] }
   0xd   : > { %s281_s30 = scalar_lea.vmem %s2652_s0, %s2121_s27  ;;  %2204 = vset.pattern.permute.xlu0 %v2221_v3  ;;  %v309_v6 = vshrl.u32 %v301_v5, 7  ;;  %v2326_v7 = vand.u32 127, %v301_v5  ;;  %v2125_v15 = vld [vmem:[%s2653_s1 + $0x1] ss:$8 sm:$0x3]  ;;  %v2139_v53 = vld [vmem:[%s2654_s2 + $0x18] sm:$0xff] }
   0xe   : > { %v2283_v0 = vld [vmem:[%s281_s30] sm:$0xff]  ;;  %vm1254_vm10 = vcmask 64512   ;;  %s2663_s25 = smov (!%p289_p4, %s2270_s25), 1  ;;  %vm2024_vm11 = vcmask 7168   ;;  %vm2026_vm12 = vcmask 11264  }
   0xf   : > { %297 = vrot.lane.b32.xlu1 %v2283_v0, %s2214_s8  ;;  %321 = vrot.lane.b32.xlu0 %v2283_v0, %s2215_s9  ;;  %v2291_v1 = vcombine.high %v2283_v0, %v2283_v0  ;;  %v2328_v8 = vsub.s32 0, %v309_v6  ;;  %v2330_v9 = vsub.s32 1, %v309_v6  ;;  %vm303_vm0 = vcmp.lt.s32.totalorder %v2326_v7, 17  ;;  %v2133_v18 = vld [vmem:[%s2653_s1 + $0x2] ss:$8 sm:$0x3] }
  0x10   : > { %vm511_vm2 = vcmp.lt.s32.totalorder %v2326_v7, 15  ;;  %vm325_vm3 = vcmp.lt.s32.totalorder %v2326_v7, 16  ;;  %v2138_v21 = vld [vmem:[%s2653_s1 + $0x3] ss:$8 sm:$0x3]  ;;  %vm617_vm4 = vcmp.lt.s32.totalorder %v2326_v7, 1 }
  0x11   : > { %v2337_v13 = vrot.slane %v306_v10, %v2328_v8  ;;  %v2340_v14 = vrot.slane %v306_v10, %v2330_v9  ;;  %v2360_v24 = vrot.slane %v2125_v15, %v2328_v8  ;;  %v2363_v25 = vrot.slane %v2125_v15, %v2330_v9  ;;  %v320_v26 = vld [vmem:[%s2654_s2] sm:$0xff]  ;;  %v2153_v15 = vld [vmem:[%s2654_s2 + $0x30] sm:$0xff]  ;;  %s2124_s26 = sshll.u32 %s2663_s25, 2 }
  0x12   : > { %v2370_v27 = vrot.slane %v2133_v18, %v2328_v8  ;;  %v2373_v28 = vrot.slane %v2133_v18, %v2330_v9  ;;  %v2377_v31 = vrot.slane %v2138_v21, %v2328_v8  ;;  %v2391_v38 = vrot.slane %v2138_v21, %v2330_v9  ;;  %v2147_v39 = vld [vmem:[%s2653_s1 + $0x5] ss:$8 sm:$0x3]  ;;  %v2152_v51 = vld [vmem:[%s2653_s1 + $0x6] ss:$8 sm:$0x3] }
  0x13   : > { %507 = vrot.lane.b32.xlu0 %v2283_v0, %s2217_s10  ;;  %299 = vrot.lane.b32.xlu1 %v2291_v1, %s2214_s8  ;;  %v2410_v47 = vrot.slane %v2147_v39, %v2328_v8  ;;  %vm805_vm6 = vcmp.lt.s32.totalorder %v2326_v7, 127  ;;  %v2418_v50 = vrot.slane %v2147_v39, %v2330_v9  ;;  %v2440_v58 = vrot.slane %v2152_v51, %v2328_v8  ;;  %v2157_v62 = vld [vmem:[%s2653_s1 + $0x7] ss:$8 sm:$0x3] }
  0x14   : > { %vm911_vm7 = vcmp.lt.s32.totalorder %v2326_v7, 113  ;;  %v2448_v61 = vrot.slane %v2152_v51, %v2330_v9  ;;  %v2143_v63 = vld [vmem:[%s2654_s2 + $0x20] sm:$0xff]  ;;  %v2470_v6 = vrot.slane %v2157_v62, %v2328_v8  ;;  %vm1017_vm8 = vcmp.lt.s32.totalorder %v2326_v7, 112 }
  0x15   : > { %vm1123_vm9 = vcmp.lt.s32.totalorder %v2326_v7, 111 }
  0x17   : > { %509 = vrot.lane.b32.xlu1 %v2291_v1, %s2217_s10  ;;  %323 = vrot.lane.b32.xlu0 %v2291_v1, %s2215_s9 }
  0x1b   : > { %615 = vrot.lane.b32.xlu1 %v2291_v1, %s2218_s11  ;;  %613 = vrot.lane.b32.xlu0 %v2283_v0, %s2218_s11 }
  0x1f   : > { %803 = vrot.lane.b32.xlu1 %v2291_v1, %s2219_s12  ;;  %801 = vrot.lane.b32.xlu0 %v2283_v0, %s2219_s12 }
  0x23   : > { %909 = vrot.lane.b32.xlu1 %v2291_v1, %s2220_s13  ;;  %907 = vrot.lane.b32.xlu0 %v2283_v0, %s2220_s13 }
  0x27   : > { %1015 = vrot.lane.b32.xlu1 %v2291_v1, %s2222_s14  ;;  %1013 = vrot.lane.b32.xlu0 %v2283_v0, %s2222_s14 }
  0x2b   : > { %1121 = vrot.lane.b32.xlu1 %v2291_v1, %s2223_s15  ;;  %1119 = vrot.lane.b32.xlu0 %v2283_v0, %s2223_s15 }
  0x2f   : > { %1228 = vperm.xlu0 %2204, %v1225_v4  }
  0x81   : > { %v298_v11 = vpop.permute.xlu1 %297  ;;  %v322_v12 = vpop.permute.xlu0 %321 }
  0x85   : > { %v508_v16 = vpop.permute.xlu0 %507  ;;  %v300_v17 = vpop.permute.xlu1 %299 }
  0x86   : > { %v304_v19 = vsel %vm303_vm0, %v298_v11, %v300_v17  ;;  %v305_v20 = vsel %vm303_vm0, %v300_v17, %v298_v11 }
  0x87   : > { %v318_v22 = vmul.f32 %v2337_v13, %v305_v20  ;;  %v319_v23 = vmul.f32 %v2340_v14, %v304_v19 }
  0x89   : > { %2130 = vmatprep.subr.msk.mxu1 %vm349_vm1, %v319_v23  ;;  %v510_v29 = vpop.permute.xlu1 %509  ;;  %v324_v30 = vpop.permute.xlu0 %323 }
  0x8a   : > { %v512_v32 = vsel %vm511_vm2, %v508_v16, %v510_v29  ;;  %v326_v33 = vsel %vm325_vm3, %v322_v12, %v324_v30  ;;  %v327_v34 = vsel %vm325_vm3, %v324_v30, %v322_v12  ;;  %2131 = vmatpush1.msk.msra.mxu1 %vm349_vm1, %v318_v22  ;;  %v513_v35 = vsel %vm511_vm2, %v510_v29, %v508_v16  ;;  %v2162_v16 = vld [vmem:[%s2653_s1 + $0x10] ss:$8 sm:$0x3] }
  0x8b   : > { %v341_v36 = vmul.f32 %v2360_v24, %v327_v34  ;;  %v342_v37 = vmul.f32 %v2363_v25, %v326_v33  ;;  %2132 = vmatmul.mubr.msk.f32.vlgmr.msra.gmra.mxu1 %vm345_vm5, %v320_v26  ;;  %v528_v41 = vmul.f32 %v2373_v28, %v512_v32  ;;  %v527_v44 = vmul.f32 %v2370_v27, %v513_v35  ;;  %v2158_v29 = vld [vmem:[%s2654_s2 + $0x38] sm:$0xff]  ;;  %v2163_v35 = vld [vmem:[%s2654_s2 + $0x40] sm:$0xff] }
  0x8c   : > { %710 = vmatprep.mubr.f32.mxu1 %v2216_v2  ;;  %v2478_v12 = vrot.slane %v2157_v62, %v2330_v9  ;;  %v2499_v23 = vrot.slane %v2162_v16, %v2328_v8  ;;  %v2502_v26 = vrot.slane %v2162_v16, %v2330_v9 }
  0x8d   : > { %v616_v42 = vpop.permute.xlu1 %615  ;;  %2127 = vmatprep.subr.msk.mxu0 %vm349_vm1, %v342_v37  ;;  %v614_v43 = vpop.permute.xlu0 %613 }
  0x8e   : > { %v618_v45 = vsel %vm617_vm4, %v614_v43, %v616_v42  ;;  %v619_v46 = vsel %vm617_vm4, %v616_v42, %v614_v43  ;;  %2128 = vmatpush1.msk.msra.mxu0 %vm349_vm1, %v341_v36 }
  0x8f   : > { %v633_v48 = vmul.f32 %v2377_v31, %v619_v46  ;;  %v634_v49 = vmul.f32 %v2391_v38, %v618_v45  ;;  %2129 = vmatmul.mubr.msk.f32.vlgmr.msra.gmra.mxu0 %vm345_vm5, %v2126_v40  ;;  %2135 = vmatprep.subr.msk.mxu0 %vm349_vm1, %v528_v41 }
  0x90   : > { %2136 = vmatpush1.msk.msra.mxu0 %vm349_vm1, %v527_v44  ;;  %604 = vmatprep.mubr.f32.mxu0 %v2216_v2 }
  0x91   : > { %v804_v54 = vpop.permute.xlu1 %803  ;;  %2140 = vmatprep.subr.msk.mxu1 %vm349_vm1, %v634_v49  ;;  %v802_v55 = vpop.permute.xlu0 %801  ;;  %2144 = vmatprep.subr.msk.mxu0 %vm349_vm1, %v2291_v1  ;;  %v2148_v1 = vld [vmem:[%s2654_s2 + $0x28] sm:$0xff] }
  0x92   : > { %v806_v56 = vsel %vm805_vm6, %v802_v55, %v804_v54  ;;  %v807_v57 = vsel %vm805_vm6, %v804_v54, %v802_v55  ;;  %2141 = vmatpush1.msk.msra.mxu1 %vm349_vm1, %v633_v48 }
  0x93   : > { %v821_v59 = vmul.f32 %v2410_v47, %v806_v56  ;;  %v822_v60 = vmul.f32 %v2418_v50, %v807_v57  ;;  %2137 = vmatmul.mubr.msk.f32.vlgmr.msra.gmra.mxu0 %vm345_vm5, %v2134_v52  ;;  %2142 = vmatmul.mubr.msk.f32.vlgmr.msra.gmra.mxu1 %vm345_vm5, %v2139_v53 }
  0x94   : > { %2145 = vmatpush1.msk.msra.mxu0 %vm349_vm1, %v2283_v0  ;;  %792 = vmatprep.mubr.f32.mxu0 %v2216_v2 }
  0x95   : > { %v910_v3 = vpop.permute.xlu1 %909  ;;  %2149 = vmatprep.subr.msk.mxu1 %vm349_vm1, %v822_v60  ;;  %v908_v4 = vpop.permute.xlu0 %907  ;;  %898 = vmatprep.mubr.f32.mxu1 %v2216_v2 }
  0x96   : > { %v912_v5 = vsel %vm911_vm7, %v908_v4, %v910_v3  ;;  %v913_v0 = vsel %vm911_vm7, %v910_v3, %v908_v4  ;;  %2150 = vmatpush1.msk.msra.mxu1 %vm349_vm1, %v821_v59 }
  0x97   : > { %v927_v10 = vmul.f32 %v2440_v58, %v912_v5  ;;  %v928_v11 = vmul.f32 %v2448_v61, %v913_v0  ;;  %2146 = vmatmul.mubr.msk.f32.vlgmr.msra.gmra.mxu0 %vm345_vm5, %v2143_v63  ;;  %2151 = vmatmul.mubr.msk.f32.vlgmr.msra.gmra.mxu1 %vm345_vm5, %v2148_v1 }
  0x98   : > { %1004 = vmatprep.mubr.f32.mxu0 %v2216_v2  ;;  %1110 = vmatprep.mubr.f32.mxu1 %v2216_v2 }
  0x99   : > { %v1016_v17 = vpop.permute.xlu1 %1015  ;;  %2154 = vmatprep.subr.msk.mxu0 %vm349_vm1, %v928_v11  ;;  %v1014_v18 = vpop.permute.xlu0 %1013 }
  0x9a   : > { %v1018_v19 = vsel %vm1017_vm8, %v1014_v18, %v1016_v17  ;;  %v1019_v20 = vsel %vm1017_vm8, %v1016_v17, %v1014_v18  ;;  %2155 = vmatpush1.msk.msra.mxu0 %vm349_vm1, %v927_v10 }
  0x9b   : > { %v1033_v21 = vmul.f32 %v2470_v6, %v1018_v19  ;;  %v1034_v22 = vmul.f32 %v2478_v12, %v1019_v20  ;;  %2156 = vmatmul.mubr.msk.f32.vlgmr.msra.gmra.mxu0 %vm345_vm5, %v2153_v15 }
  0x9c   : > { %1216 = vmatprep.mubr.f32.mxu0 %v2216_v2 }
  0x9d   : > { %v1122_v30 = vpop.permute.xlu1 %1121  ;;  %2159 = vmatprep.subr.msk.mxu1 %vm349_vm1, %v1034_v22  ;;  %v1120_v32 = vpop.permute.xlu0 %1119 }
  0x9e   : > { %v1124_v33 = vsel %vm1123_vm9, %v1120_v32, %v1122_v30  ;;  %v1125_v8 = vsel %vm1123_vm9, %v1122_v30, %v1120_v32  ;;  %2160 = vmatpush1.msk.msra.mxu1 %vm349_vm1, %v1033_v21  ;;  %v1997_v30 = vld [vmem:[%s2657_s5] sm:$0xf] }
  0x9f   : > { %v1139_v9 = vmul.f32 %v2499_v23, %v1124_v33  ;;  %v1140_v34 = vmul.f32 %v2502_v26, %v1125_v8  ;;  %2161 = vmatmul.mubr.msk.f32.vlgmr.msra.gmra.mxu1 %vm345_vm5, %v2158_v29 }
  0xa0   : > { %1322 = vmatprep.mubr.f32.mxu1 %v2216_v2 }
  0xa1   : > { %2164 = vmatprep.subr.msk.mxu0 %vm349_vm1, %v1140_v34 }
  0xa2   : > { %2165 = vmatpush1.msk.msra.mxu0 %vm349_vm1, %v1139_v9 }
  0xa3   : > { %2166 = vmatmul.mubr.msk.f32.vlgmr.msra.gmra.mxu0 %vm345_vm5, %v2163_v35 }
  0xa4   : > { %1396 = vmatprep.mubr.f32.mxu0 %v2216_v2 }
  0xaa   : > { %v1229_v15 = vpop.permute.xlu0 %1228 }
 0x14b   : > { %v502_v36 = vpop.f32.mrf.mxu1 }
 0x14d   : > { %v504_v39 = vpop.f32.mrf.mxu1 }
 0x14f   : > { %v422_v37 = vpop.f32.mrf.mxu0 }
 0x150   : > { %v503_v40 = vadd.f32 %v502_v36, %v422_v37 }
 0x151   : > { %v424_v41 = vpop.f32.mrf.mxu0 }
 0x152   : > { %v505_v42 = vadd.f32 %v504_v39, %v424_v41  ;;  %v2167_v39 = vld [vmem:[%s2656_s4 + $0x4] sm:$0xf] }
 0x153   : > { %v606_v43 = vpop.f32.mrf.mxu0  ;;  %v712_v44 = vpop.f32.mrf.mxu1 }
 0x154   : > { %v611_v45 = vadd.f32 %v606_v43, %v503_v40 }
 0x155   : > { %v608_v46 = vpop.f32.mrf.mxu0  ;;  %v714_v48 = vpop.f32.mrf.mxu1 }
 0x156   : > { %v612_v49 = vadd.f32 %v608_v46, %v505_v42  ;;  %v717_v51 = vadd.f32 %v712_v44, %v611_v45 }
 0x157   : > { %v794_v52 = vpop.f32.mrf.mxu0  ;;  %v900_v53 = vpop.f32.mrf.mxu1 }
 0x158   : > { %v718_v54 = vadd.f32 %v714_v48, %v612_v49  ;;  %v799_v55 = vadd.f32 %v794_v52, %v717_v51  ;;  %v2170_v51 = vld [vmem:[%s2656_s4 + $0x8] sm:$0xf] }
 0x159   : > { %v796_v56 = vpop.f32.mrf.mxu0  ;;  %v902_v60 = vpop.f32.mrf.mxu1 }
 0x15a   : > { %v800_v57 = vadd.f32 %v796_v56, %v718_v54  ;;  %v905_v59 = vadd.f32 %v900_v53, %v799_v55  ;;  %v2172_v55 = vld [vmem:[%s2656_s4 + $0xc] sm:$0xf]  ;;  %v2174_v56 = vld [vmem:[%s2656_s4 + $0x10] sm:$0xf] }
 0x15b   : > { %v1006_v62 = vpop.f32.mrf.mxu0 }
 0x15c   : > { %v906_v63 = vadd.f32 %v902_v60, %v800_v57  ;;  %v1011_v1 = vadd.f32 %v1006_v62, %v905_v59 }
 0x15d   : > { %v1008_v3 = vpop.f32.mrf.mxu0 }
 0x15e   : > { %v1012_v0 = vadd.f32 %v1008_v3, %v906_v63  ;;  %v2176_v63 = vld [vmem:[%s2656_s4 + $0x14] sm:$0xf] }
 0x15f   : > { %v1112_v4 = vpop.f32.mrf.mxu1 }
 0x160   : > { %v1117_v10 = vadd.f32 %v1112_v4, %v1011_v1 }
 0x161   : > { %v1114_v5 = vpop.f32.mrf.mxu1 }
 0x162   : > { %v1118_v16 = vadd.f32 %v1114_v5, %v1012_v0  ;;  %v2178_v0 = vld [vmem:[%s2656_s4 + $0x18] sm:$0xf] }
 0x163   : > { %v1218_v11 = vpop.f32.mrf.mxu0 }
 0x164   : > { %v1223_v17 = vadd.f32 %v1218_v11, %v1117_v10 }
 0x165   : > { %v1220_v18 = vpop.f32.mrf.mxu0 }
 0x166   : > { %v1224_v19 = vadd.f32 %v1220_v18, %v1118_v16  ;;  %v1231_v20 = vadd.f32 %v1229_v15, %v1223_v17  ;;  %v2180_v16 = vld [vmem:[%s2656_s4 + $0x1c] sm:$0xf] }
 0x168   : > { %v1232_v21 = vadd.f32 %v1229_v15, %v1224_v19  ;;  %v1233_v22 = vmax.f32 %v1231_v20, 0.0 }
 0x16a   : > { %1235 = vrot.lane.b32.xlu0 %v1233_v22, %s2214_s8  ;;  %1244 = vrot.lane.b32.xlu1 %v1233_v22, %s2215_s9  ;;  %v1234_v29 = vmax.f32 %v1232_v21, 0.0 }
 0x16e   : > { %1403 = vrot.lane.b32.xlu0 %v1233_v22, %s2217_s10  ;;  %1246 = vrot.lane.b32.xlu1 %v1234_v29, %s2215_s9 }
 0x172   : > { %1489 = vrot.lane.b32.xlu0 %v1233_v22, %s2218_s11  ;;  %1237 = vrot.lane.b32.xlu1 %v1234_v29, %s2214_s8 }
 0x176   : > { %1653 = vrot.lane.b32.xlu0 %v1233_v22, %s2219_s12  ;;  %1405 = vrot.lane.b32.xlu1 %v1234_v29, %s2217_s10  ;;  %s287_s10 = scalar_lea.vmem %s2658_s6, %s2121_s27 }
 0x17a   : > { %1739 = vrot.lane.b32.xlu0 %v1233_v22, %s2220_s13  ;;  %1491 = vrot.lane.b32.xlu1 %v1234_v29, %s2218_s11 }
 0x17e   : > { %1825 = vrot.lane.b32.xlu0 %v1233_v22, %s2222_s14  ;;  %1655 = vrot.lane.b32.xlu1 %v1234_v29, %s2219_s12  ;;  %s292_s12 = scalar_lea.vmem %s2659_s7, %s2124_s26 }
 0x182   : > { %1911 = vrot.lane.b32.xlu0 %v1233_v22, %s2223_s15  ;;  %1741 = vrot.lane.b32.xlu1 %v1234_v29, %s2220_s13 }
 0x186   : > { %2000 = vperm.xlu0 %2204, %v1997_v30   ;;  %1827 = vrot.lane.b32.xlu1 %v1234_v29, %s2222_s14 }
 0x18a   : > { %1913 = vrot.lane.b32.xlu1 %v1234_v29, %s2223_s15 }
 0x1dc   : > { %v1236_v32 = vpop.permute.xlu0 %1235  ;;  %v1245_v33 = vpop.permute.xlu1 %1244 }
 0x1e0   : > { %v1404_v8 = vpop.permute.xlu0 %1403  ;;  %v1247_v9 = vpop.permute.xlu1 %1246 }
 0x1e1   : > { %v1248_v34 = vsel %vm325_vm3, %v1245_v33, %v1247_v9  ;;  %v1249_v35 = vsel %vm325_vm3, %v1247_v9, %v1245_v33 }
 0x1e2   : > { %v1250_v36 = vmul.f32 %v1249_v35, %v2360_v24  ;;  %v1251_v37 = vmul.f32 %v1248_v34, %v2363_v25  ;;  %v1243_v25 = vld [vmem:[%s2656_s4] sm:$0xf] }
 0x1e4   : > { %v1490_v40 = vpop.permute.xlu0 %1489  ;;  %1288 = vmatprep.subr.mxu1 %v1251_v37  ;;  %v1238_v41 = vpop.permute.xlu1 %1237 }
 0x1e5   : > { %v1239_v42 = vsel %vm303_vm0, %v1236_v32, %v1238_v41  ;;  %v1240_v43 = vsel %vm303_vm0, %v1238_v41, %v1236_v32  ;;  %1289 = vmatpush1.msra.mxu1 %v1250_v36 }
 0x1e6   : > { %v1241_v44 = vmul.f32 %v1240_v43, %v2337_v13  ;;  %v1242_v24 = vmul.f32 %v1239_v42, %v2340_v14  ;;  %2168 = vmatmul.mubr.msk.f32.vlgmr.msra.gmra.mxu1 %vm1254_vm10, %v2167_v39 }
 0x1e7   : > { %1480 = vmatprep.mubr.f32.mxu1 %v2216_v2 }
 0x1e8   : > { %1362 = vmatprep.subr.mxu0 %v1242_v24  ;;  %v1406_v45 = vpop.permute.xlu1 %1405  ;;  %v1654_v13 = vpop.permute.xlu0 %1653 }
 0x1e9   : > { %v1407_v46 = vsel %vm511_vm2, %v1404_v8, %v1406_v45  ;;  %v1408_v48 = vsel %vm511_vm2, %v1406_v45, %v1404_v8  ;;  %1363 = vmatpush1.msra.mxu0 %v1241_v44 }
 0x1ea   : > { %v1409_v14 = vmul.f32 %v1408_v48, %v2370_v27  ;;  %v1410_v49 = vmul.f32 %v1407_v46, %v2373_v28  ;;  %2169 = vmatmul.mubr.msk.f32.vlgmr.msra.gmra.mxu0 %vm1254_vm10, %v1243_v25 }
 0x1eb   : > { %1566 = vmatprep.mubr.f32.mxu0 %v2216_v2 }
 0x1ec   : > { %1446 = vmatprep.subr.mxu1 %v1410_v49  ;;  %v1492_v52 = vpop.permute.xlu1 %1491  ;;  %v1740_v57 = vpop.permute.xlu0 %1739 }
 0x1ed   : > { %v1493_v53 = vsel %vm617_vm4, %v1490_v40, %v1492_v52  ;;  %v1494_v54 = vsel %vm617_vm4, %v1492_v52, %v1490_v40  ;;  %1447 = vmatpush1.msra.mxu1 %v1409_v14 }
 0x1ee   : > { %v1495_v27 = vmul.f32 %v1494_v54, %v2377_v31  ;;  %v1496_v28 = vmul.f32 %v1493_v53, %v2391_v38  ;;  %1610 = vmatprep.subr.mxu1 %v1234_v29  ;;  %2171 = vmatmul.mubr.msk.f32.vlgmr.msra.gmra.mxu1 %vm1254_vm10, %v2170_v51 }
 0x1ef   : > { %1611 = vmatpush1.msra.mxu1 %v1233_v22  ;;  %1644 = vmatprep.mubr.f32.mxu1 %v2216_v2 }
 0x1f0   : > { %1532 = vmatprep.subr.mxu0 %v1496_v28  ;;  %v1656_v59 = vpop.permute.xlu1 %1655 }
 0x1f1   : > { %v1657_v31 = vsel %vm805_vm6, %v1654_v13, %v1656_v59  ;;  %v1658_v38 = vsel %vm805_vm6, %v1656_v59, %v1654_v13  ;;  %1533 = vmatpush1.msra.mxu0 %v1495_v27 }
 0x1f2   : > { %v1659_v60 = vmul.f32 %v1657_v31, %v2410_v47  ;;  %v1660_v62 = vmul.f32 %v1658_v38, %v2418_v50  ;;  %2173 = vmatmul.mubr.msk.f32.vlgmr.msra.gmra.mxu0 %vm1254_vm10, %v2172_v55  ;;  %2175 = vmatmul.mubr.msk.f32.vlgmr.msra.gmra.mxu1 %vm1254_vm10, %v2174_v56  ;;  %v1826_v50 = vpop.permute.xlu0 %1825 }
 0x1f3   : > { %1730 = vmatprep.mubr.f32.mxu0 %v2216_v2  ;;  %1816 = vmatprep.mubr.f32.mxu1 %v2216_v2 }
 0x1f4   : > { %1696 = vmatprep.subr.mxu0 %v1660_v62  ;;  %v1742_v1 = vpop.permute.xlu1 %1741 }
 0x1f5   : > { %v1743_v3 = vsel %vm911_vm7, %v1740_v57, %v1742_v1  ;;  %v1744_v47 = vsel %vm911_vm7, %v1742_v1, %v1740_v57  ;;  %1697 = vmatpush1.msra.mxu0 %v1659_v60 }
 0x1f6   : > { %v1745_v4 = vmul.f32 %v1743_v3, %v2440_v58  ;;  %v1746_v5 = vmul.f32 %v1744_v47, %v2448_v61  ;;  %2177 = vmatmul.mubr.msk.f32.vlgmr.msra.gmra.mxu0 %vm1254_vm10, %v2176_v63  ;;  %v1912_v17 = vpop.permute.xlu0 %1911 }
 0x1f7   : > { %1902 = vmatprep.mubr.f32.mxu0 %v2216_v2 }
 0x1f8   : > { %1782 = vmatprep.subr.mxu1 %v1746_v5  ;;  %v1828_v10 = vpop.permute.xlu1 %1827 }
 0x1f9   : > { %v1829_v11 = vsel %vm1017_vm8, %v1826_v50, %v1828_v10  ;;  %v1830_v15 = vsel %vm1017_vm8, %v1828_v10, %v1826_v50  ;;  %1783 = vmatpush1.msra.mxu1 %v1745_v4 }
 0x1fa   : > { %v1831_v58 = vmul.f32 %v1829_v11, %v2470_v6  ;;  %v1832_v61 = vmul.f32 %v1830_v15, %v2478_v12  ;;  %2179 = vmatmul.mubr.msk.f32.vlgmr.msra.gmra.mxu1 %vm1254_vm10, %v2178_v0 }
 0x1fb   : > { %1988 = vmatprep.mubr.f32.mxu1 %v2216_v2  ;;  %v2182_v2 = vld [vmem:[%s2656_s4 + $0x20] sm:$0xf] }
 0x1fc   : > { %1868 = vmatprep.subr.mxu0 %v1832_v61  ;;  %v1914_v18 = vpop.permute.xlu1 %1913 }
 0x1fd   : > { %v1915_v19 = vsel %vm1123_vm9, %v1912_v17, %v1914_v18  ;;  %v1916_v20 = vsel %vm1123_vm9, %v1914_v18, %v1912_v17  ;;  %1869 = vmatpush1.msra.mxu0 %v1831_v58 }
 0x1fe   : > { %v1917_v6 = vmul.f32 %v1915_v19, %v2499_v23  ;;  %v1918_v12 = vmul.f32 %v1916_v20, %v2502_v26  ;;  %2181 = vmatmul.mubr.msk.f32.vlgmr.msra.gmra.mxu0 %vm1254_vm10, %v2180_v16 }
 0x200   : > { %1954 = vmatprep.subr.mxu1 %v1918_v12 }
 0x201   : > { %1955 = vmatpush1.msra.mxu1 %v1917_v6  ;;  %v2001_v54 = vpop.permute.xlu0 %2000 }
 0x202   : > { %2183 = vmatmul.mubr.msk.f32.vlgmr.msra.gmra.mxu1 %vm1254_vm10, %v2182_v2 }
 0x2a6   : > { %v1324_v21 = vpop.f32.mrf.mxu1 }
 0x2a8   : > { %v1326_v22 = vpop.f32.mrf.mxu1 }
 0x2aa   : > { %v1398_v29 = vpop.f32.mrf.mxu0 }
 0x2ab   : > { %v1399_v7 = vadd.f32 %v1398_v29, %v1324_v21 }
 0x2ac   : > { %v1400_v30 = vpop.f32.mrf.mxu0 }
 0x2ad   : > { %v1401_v32 = vadd.f32 %v1400_v30, %v1326_v22 }
 0x2ae   : > { %v1482_v33 = vpop.f32.mrf.mxu1 }
 0x2af   : > { %v1487_v23 = vadd.f32 %v1482_v33, %v1399_v7 }
 0x2b0   : > { %v1484_v8 = vpop.f32.mrf.mxu1 }
 0x2b1   : > { %v1488_v26 = vadd.f32 %v1484_v8, %v1401_v32 }
 0x2b2   : > { %v1568_v9 = vpop.f32.mrf.mxu0  ;;  %v1646_v34 = vpop.f32.mrf.mxu1 }
 0x2b3   : > { %v1573_v35 = vadd.f32 %v1568_v9, %v1487_v23 }
 0x2b4   : > { %v1570_v36 = vpop.f32.mrf.mxu0  ;;  %v1648_v40 = vpop.f32.mrf.mxu1 }
 0x2b5   : > { %v1574_v37 = vadd.f32 %v1570_v36, %v1488_v26  ;;  %v1651_v39 = vadd.f32 %v1646_v34, %v1573_v35 }
 0x2b6   : > { %v1732_v41 = vpop.f32.mrf.mxu0 }
 0x2b7   : > { %v1652_v42 = vadd.f32 %v1648_v40, %v1574_v37  ;;  %v1737_v43 = vadd.f32 %v1732_v41, %v1651_v39 }
 0x2b8   : > { %v1734_v44 = vpop.f32.mrf.mxu0 }
 0x2b9   : > { %v1738_v25 = vadd.f32 %v1734_v44, %v1652_v42 }
 0x2ba   : > { %v1818_v24 = vpop.f32.mrf.mxu1 }
 0x2bb   : > { %v1823_v45 = vadd.f32 %v1818_v24, %v1737_v43 }
 0x2bc   : > { %v1820_v46 = vpop.f32.mrf.mxu1 }
 0x2bd   : > { %v1824_v14 = vadd.f32 %v1820_v46, %v1738_v25 }
 0x2be   : > { %v1904_v48 = vpop.f32.mrf.mxu0 }
 0x2bf   : > { %v1909_v49 = vadd.f32 %v1904_v48, %v1823_v45 }
 0x2c0   : > { %v1906_v13 = vpop.f32.mrf.mxu0 }
 0x2c1   : > { %v1910_v52 = vadd.f32 %v1906_v13, %v1824_v14 }
 0x2c2   : > { %v1990_v51 = vpop.f32.mrf.mxu1 }
 0x2c3   : > { %v1995_v53 = vadd.f32 %v1990_v51, %v1909_v49 }
 0x2c4   : > { %v1992_v27 = vpop.f32.mrf.mxu1 }
 0x2c5   : > { %v2003_v28 = vadd.f32 %v2001_v54, %v1995_v53  ;;  %v1996_v55 = vadd.f32 %v1992_v27, %v1910_v52 }
 0x2c7   : > { %v2005_v56 = vmax.f32 %v2003_v28, 0.0  ;;  %v2004_v57 = vadd.f32 %v2001_v54, %v1996_v55 }
 0x2c9   : > { %v2006_v59 = vmax.f32 %v2004_v57, 0.0  ;;  %v2017_v31 = vmul.f32 %v2005_v56, %v2005_v56  ;;  %v2012_v60 = vsel %vm349_vm1, %v2005_v56, 0.0 }
 0x2cb   : > { %v2009_v38 = vcombine.low %v2005_v56, %v2006_v59  ;;  %v2013_v62 = vsel %vm349_vm1, %v2006_v59, 0.0  ;;  %v2018_v63 = vmul.f32 %v2006_v59, %v2006_v59  ;;  %v2019_v3 = vsel %vm349_vm1, %v2017_v31, 0.0 }
 0x2cc   : > { %v2014_v1 = vadd.f32 %v2013_v62, %v2012_v60 }
 0x2cd   : > { %2011 = vst [vmem:[%s287_s10] sm:$0xff] %v2009_v38  ;;  %v2020_v47 = vsel %vm349_vm1, %v2018_v63, 0.0 }
 0x2ce   : > { %2015 = vadd.xlane.f32.xlu1 %v2014_v1  ;;  %v2021_v50 = vadd.f32 %v2020_v47, %v2019_v3 }
 0x2d0   : > { %2022 = vadd.xlane.f32.xlu0 %v2021_v50 }
 0x357   : > { %v2016_v4 = vpop.xlane.xlu1 %2015 }
 0x359   : > { %v2023_v5 = vpop.xlane.xlu0 %2022 }
 0x35a   : > { %v2025_v0 = vsel %vm2024_vm11, %v2016_v4, %v2023_v5 }
 0x35b   : > { %2027 = vst.msk [vmem:[%s292_s12] sm:$0xf] %vm2026_vm12, %v2025_v0 }
 0x35c PF: > { %s18_s24 = sadd.s32 1, %s2212_s24  }
 0x35d   : > { %p15_p5 = scmp.ge.s32.totalorder %s18_s24, 4  }
 0x35f   :  { %17 = sbr.rel (!%p15_p5) target bundleno = 1 (0x1), region = 109 }

</bundles_post_ra>
